<compile_context>
chip_gen: v7x
topology: tpu7x:2x2x1
jax: 0.10.0
libtpu: 0.0.40
codegen_flags: <defaults>
</compile_context>

<pallas_src>
import functools

import jax
import jax.numpy as jnp
from jax import lax
from jax.experimental import pallas as pl
from jax.experimental.pallas import tpu as pltpu

_EPS = 1e-5
_DEN_GUARD = 1e-30


def _softmax_rows(x):
    # lane-axis softmax; divide replaced by EUP approx reciprocal.
    m = jnp.max(x, axis=-1, keepdims=True)
    e = jnp.exp(x - m)
    return e * pl.reciprocal(jnp.sum(e, axis=-1, keepdims=True), approx=True)


def _attention_kernel(x1_ref, x2_ref, wpre_ref, bpre_ref, wpost_ref, bpost_ref,
                      o1_ref, o2_ref,
                      num1_ref, y2_ref, thb_ref, m1_ref,
                      *, tq, bf16_exp, cast_proj):
    f32 = jnp.float32
    bf16 = jnp.bfloat16
    c0 = (((0,), (0,)), ((), ()))   # contract leading dims  (a^T @ b)
    c1 = (((1,), (1,)), ((), ()))   # contract trailing dims (a @ b^T)

    x1 = x1_ref[0]                  # (C, N) channel-first, N = H*W on lanes
    x2 = x2_ref[0]                  # (C, N)
    n = x1.shape[1]
    ic = wpre_ref.shape[1] // 2     # inter_channels
    n_tiles = n // tq
    pdt = bf16 if cast_proj else f32   # projection matmul operand dtype

    # ---- fused pre-projections (BN folded + 1x1 conv): 2 MXU calls -----------------
    # rows [0:ic) = g-branch, rows [ic:2ic) = theta (x1) / phi (x2) branch.
    p1 = jnp.dot(wpre_ref[0].astype(pdt), x1.astype(pdt),
                 preferred_element_type=f32) + bpre_ref[0]                 # (2I, N)
    p2 = jnp.dot(wpre_ref[1].astype(pdt), x2.astype(pdt),
                 preferred_element_type=f32) + bpre_ref[1]                 # (2I, N)
    g1, th = p1[:ic], p1[ic:]       # g_x11, theta_x1
    g2, ph = p2[:ic], p2[ic:]       # g_x21, phi_x1

    # ---- temporal energies (I x I, tiny; kept f32 for accuracy) --------------------
    et1 = lax.dot_general(th, ph, c1, preferred_element_type=f32)   # theta_x1 @ phi_x2
    et2 = lax.dot_general(ph, th, c1, preferred_element_type=f32)   # = et1^T (tiny)
    et1s = _softmax_rows(et1)
    et2s = _softmax_rows(et2)

    # m1/m2 carry an extra ones-row: the spatial softmax denominators are produced as
    # an extra MXU output row and the normalization is deferred to small tensors.
    ones_row = jnp.ones((1, n), f32)
    m1_ref[...] = jnp.concatenate(
        [jnp.dot(et2s, g1, preferred_element_type=f32), ones_row], axis=0)          # (I+1, N) f32
    m2 = jnp.concatenate(
        [jnp.dot(et1s, g2, preferred_element_type=f32), ones_row], axis=0).astype(bf16)

    thb_ref[...] = th.astype(bf16)   # bf16 operands for the big energy matmuls
    ph_b = ph.astype(bf16)
    num1_ref[...] = jnp.zeros_like(num1_ref)

    # ---- flash-style loop over row tiles of the (virtual) N x N spatial energy -----
    def tile_body(t, m_run):
        start = pl.multiple_of(t * tq, tq)
        th_t = thb_ref[:, pl.ds(start, tq)]                                  # (I, Tq) bf16
        # A_tile[q, k] = sum_i theta[i, q+start] * phi[i, k]
        a_t = lax.dot_general(th_t, ph_b, c0, preferred_element_type=f32)    # (Tq, N)
        c_t = jnp.max(jnp.max(a_t, axis=-1, keepdims=True),
                      axis=-2, keepdims=True)                                # (1, 1) tile max
        m_new = jnp.maximum(m_run, c_t)
        shifted = a_t - c_t
        if bf16_exp:                         # bf16 EUP path (v6e/v7x)
            e_t = jnp.exp(shifted.astype(bf16))
        else:                                # f32 exp (v5e and older)
            e_t = jnp.exp(shifted).astype(bf16)

        # y2 columns for this tile (row-normalized: the per-tile shift cancels).
        r2 = lax.dot_general(m2, e_t, c1, preferred_element_type=f32)        # (I+1, Tq)
        y2_ref[:, pl.ds(start, tq)] = r2[:ic] * pl.reciprocal(
            jnp.maximum(r2[ic:], _DEN_GUARD), approx=True)

        # y1 numerators/denominators, flash-style running-max rescale over tiles.
        m1_t = m1_ref[:, pl.ds(start, tq)]                                   # (I+1, Tq)
        scale_t = jnp.exp(c_t - m_new)       # <= 1
        rescale = jnp.exp(m_run - m_new)     # <= 1
        contrib = jnp.dot((m1_t * scale_t).astype(bf16), e_t,
                          preferred_element_type=f32)                        # (I+1, N)
        num1_ref[...] = num1_ref[...] * rescale + contrib
        return m_new

    lax.fori_loop(0, n_tiles, tile_body, jnp.full((1, 1), -1e30, f32))

    # ---- deferred normalization + post-projection (1x1 conv + BN folded) + residual
    num1 = num1_ref[...]
    y1 = num1[:ic] * pl.reciprocal(jnp.maximum(num1[ic:], _DEN_GUARD), approx=True)
    o1_ref[0] = (x1 + jnp.dot(wpost_ref[0].astype(pdt), y1.astype(pdt),
                              preferred_element_type=f32)
                 + bpost_ref[0]).astype(o1_ref.dtype)
    y2 = y2_ref[...]
    o2_ref[0] = (x2 + jnp.dot(wpost_ref[1].astype(pdt), y2.astype(pdt),
                              preferred_element_type=f32)
                 + bpost_ref[1]).astype(o2_ref.dtype)


def _row_tile(n):
    """128-aligned row tile that divides N, fits a ~12 MiB per-tile budget and (when
    possible) yields >= 2 tiles so the flash loop is actually exercised."""
    budget = 12 << 20                      # ~6 bytes/elem per tile (f32 A + bf16 E)
    divisors = [t for t in (512, 256, 128) if n % t == 0]
    if not divisors:
        return n                           # small / odd N: single full tile
    fitting = [t for t in divisors if 6 * t * n <= budget]
    pool = fitting if fitting else [divisors[-1]]
    for t in pool:
        if n // t >= 2:
            return t
    return pool[0]


def _vmem_limit(C, I, N, tq):
    need = (16 * C * N                                     # x1,x2,o1,o2 blocks (double-buffered f32)
            + 8 * (2 * (2 * I) * C + 2 * C * I + 4 * C + 4 * I)   # weights / biases
            + 16 * I * N + 4 * I * N                       # p1,p2 f32 + th/ph bf16
            + 10 * (I + 1) * N                             # m1 f32, m2 bf16, num1 scratch
            + 4 * I * N                                    # y2 scratch
            + 6 * tq * N)                                  # per-tile A (f32) + E (bf16)
    try:
        phys = int(pltpu.get_tpu_info().vmem_capacity_bytes)
    except Exception:
        phys = 64 << 20                                    # conservative (v7x-sized) fallback
    cap = (phys * 3) // 4                                  # headroom for Mosaic scratch
    return int(min(cap, max(32 << 20, 2 * need + (4 << 20))))


def spatiotemporal_attention(x1_nchw, x2_nchw, wpre, bpre, wpost, bpost):
    B, C, H, W = x1_nchw.shape
    N = H * W
    I2 = wpre.shape[1]              # 2 * inter_channels
    I = I2 // 2

    # channel-first (C, N): pure reshape, no HBM transpose; last dim lane-dense.
    x1 = x1_nchw.reshape(B, C, N)
    x2 = x2_nchw.reshape(B, C, N)

    tq = _row_tile(N)
    vmem_limit = _vmem_limit(C, I, N, tq)

    # bf16 exp only on generations with a bf16 EUP; f32 exp elsewhere (always correct).
    try:
        kind = jax.devices()[0].device_kind.lower()
    except Exception:
        kind = ""
    bf16_exp = bool(kind) and not any(v in kind for v in ("v2", "v3", "v4", "v5"))
    cast_proj = C >= 128            # bf16 projection operands only when K=C is large

    kernel = functools.partial(_attention_kernel, tq=tq, bf16_exp=bf16_exp,
                               cast_proj=cast_proj)

    grid_spec = pltpu.PrefetchScalarGridSpec(
        num_scalar_prefetch=0,
        grid=(B,),
        in_specs=[
            pl.BlockSpec((1, C, N), lambda b: (b, 0, 0)),
            pl.BlockSpec((1, C, N), lambda b: (b, 0, 0)),
            pl.BlockSpec((2, I2, C), lambda b: (0, 0, 0)),   # fused pre weights
            pl.BlockSpec((2, I2, 1), lambda b: (0, 0, 0)),   # fused pre biases
            pl.BlockSpec((2, C, I), lambda b: (0, 0, 0)),    # post weights
            pl.BlockSpec((2, C, 1), lambda b: (0, 0, 0)),    # post biases
        ],
        out_specs=[
            pl.BlockSpec((1, C, N), lambda b: (b, 0, 0)),
            pl.BlockSpec((1, C, N), lambda b: (b, 0, 0)),
        ],
        scratch_shapes=[
            pltpu.VMEM((I + 1, N), jnp.float32),   # num1 accumulator (+ ones row)
            pltpu.VMEM((I, N), jnp.float32),       # y2 columns
            pltpu.VMEM((I, N), jnp.bfloat16),      # theta (bf16, sliced per tile)
            pltpu.VMEM((I + 1, N), jnp.float32),   # m1 (et2s @ g1, + ones row)
        ],
    )
    o1, o2 = pl.pallas_call(
        kernel,
        out_shape=(jax.ShapeDtypeStruct((B, C, N), jnp.float32),
                   jax.ShapeDtypeStruct((B, C, N), jnp.float32)),
        grid_spec=grid_spec,
        compiler_params=pltpu.CompilerParams(
            dimension_semantics=("parallel",),
            vmem_limit_bytes=vmem_limit,
        ),
    )(x1, x2, wpre, bpre, wpost, bpost)

    return o1.reshape(B, C, H, W), o2.reshape(B, C, H, W)


# ---------------- deterministic parameter construction & folding ----------------

def _rand_bn(key, ch):
    k1, k2, k3, k4 = jax.random.split(key, 4)
    return dict(
        gamma=jax.random.uniform(k1, (ch,), jnp.float32, 0.5, 1.5),
        beta=jax.random.normal(k2, (ch,), jnp.float32) * 0.1,
        mean=jax.random.normal(k3, (ch,), jnp.float32) * 0.1,
        var=jax.random.uniform(k4, (ch,), jnp.float32, 0.5, 1.5),
    )


def make_raw_params(key, C, I):
    names = ["g1", "g2", "theta", "phi", "W1", "W2"]
    keys = jax.random.split(key, len(names) * 3)
    raw = {}
    for idx, name in enumerate(names):
        kb, kw, kbi = keys[3 * idx], keys[3 * idx + 1], keys[3 * idx + 2]
        if name in ("W1", "W2"):
            w = jax.random.normal(kw, (C, I), jnp.float32) * 0.5   # conv: inter -> in
            b = jax.random.normal(kbi, (C,), jnp.float32) * 0.1
        else:
            w = jax.random.normal(kw, (I, C), jnp.float32) * 0.5   # conv: in -> inter
            b = jax.random.normal(kbi, (I,), jnp.float32) * 0.1
        raw[name] = dict(w=w, b=b, **_rand_bn(kb, C))
    return raw


def fold_pre(p):
    # BN (eval) followed by 1x1 conv, channel-first: y = Weff @ x + beff[:, None]
    s = p["gamma"] / jnp.sqrt(p["var"] + _EPS)
    t = p["beta"] - p["mean"] * s
    weff = p["w"] * s[None, :]            # (I, C)
    beff = p["b"] + p["w"] @ t            # (I,)
    return weff, beff


def fold_post(p):
    # 1x1 conv followed by BN (eval), channel-first: z = Weff @ y + beff[:, None]
    s = p["gamma"] / jnp.sqrt(p["var"] + _EPS)
    t = p["beta"] - p["mean"] * s
    weff = p["w"] * s[:, None]            # (C, I)
    beff = p["b"] * s + t                 # (C,)
    return weff, beff[:, None]            # (C, 1)


# --------------------------- pure-JAX reference (NCHW) ---------------------------

def reference(x1, x2, raw):
    def pre(x, p):
        s = p["gamma"] / jnp.sqrt(p["var"] + _EPS)
        t = p["beta"] - p["mean"] * s
        xn = x * s[None, :, None, None] + t[None, :, None, None]
        return jnp.einsum("bchw,ic->bihw", xn, p["w"]) + p["b"][None, :, None, None]

    def post(y, p):
        z = jnp.einsum("bihw,ci->bchw", y, p["w"]) + p["b"][None, :, None, None]
        s = p["gamma"] / jnp.sqrt(p["var"] + _EPS)
        t = p["beta"] - p["mean"] * s
        return z * s[None, :, None, None] + t[None, :, None, None]

    B, C, H, W = x1.shape
    I = raw["g1"]["w"].shape[0]
    N = H * W
    g_x11 = pre(x1, raw["g1"]).reshape(B, I, N)
    g_x21 = pre(x2, raw["g2"]).reshape(B, I, N)
    theta_x1 = pre(x1, raw["theta"]).reshape(B, I, N)
    phi_x1 = pre(x2, raw["phi"]).reshape(B, I, N)
    theta_x2 = jnp.transpose(theta_x1, (0, 2, 1))
    phi_x2 = jnp.transpose(phi_x1, (0, 2, 1))
    et1 = jnp.matmul(theta_x1, phi_x2)
    et2 = jnp.transpose(et1, (0, 2, 1))
    es1 = jnp.matmul(theta_x2, phi_x1)
    es2 = jnp.transpose(es1, (0, 2, 1))
    et1s = jax.nn.softmax(et1, axis=-1)
    et2s = jax.nn.softmax(et2, axis=-1)
    es2s = jax.nn.softmax(es1, axis=-2)
    es1s = jax.nn.softmax(es2, axis=-2)
    y1 = jnp.matmul(jnp.matmul(et2s, g_x11), es2s).reshape(B, I, H, W)
    y2 = jnp.matmul(jnp.matmul(et1s, g_x21), es1s).reshape(B, I, H, W)
    return x1 + post(y1, raw["W1"]), x2 + post(y2, raw["W2"])


if __name__ == "__main__":
    B, C, H, W = 2, 4, 16, 16          # in_channels=4 -> inter_channels=2
    I = max(C // 2, 1)

    key = jax.random.PRNGKey(0)
    kx1, kx2, kp = jax.random.split(key, 3)
    x1 = jax.random.normal(kx1, (B, C, H, W), jnp.float32)
    x2 = jax.random.normal(kx2, (B, C, H, W), jnp.float32)

    raw = make_raw_params(kp, C, I)

    # fold BN+conv into affine params (channel-first) and fuse the pre-projections:
    # per input, rows [0:I) = g-branch, rows [I:2I) = theta/phi branch.
    wg1, bg1 = fold_pre(raw["g1"])
    wth, bth = fold_pre(raw["theta"])
    wg2, bg2 = fold_pre(raw["g2"])
    wph, bph = fold_pre(raw["phi"])
    w1, b1 = fold_post(raw["W1"])
    w2, b2 = fold_post(raw["W2"])

    wpre = jnp.stack([jnp.concatenate([wg1, wth], axis=0),
                      jnp.concatenate([wg2, wph], axis=0)])            # (2, 2I, C)
    bpre = jnp.stack([jnp.concatenate([bg1, bth], axis=0)[:, None],
                      jnp.concatenate([bg2, bph], axis=0)[:, None]])   # (2, 2I, 1)
    wpost = jnp.stack([w1, w2])                                        # (2, C, I)
    bpost = jnp.stack([b1, b2])                                        # (2, C, 1)

    run = jax.jit(spatiotemporal_attention)
    o1, o2 = run(x1, x2, wpre, bpre, wpost, bpost)
    jax.block_until_ready((o1, o2))

    r1, r2 = reference(x1, x2, raw)
    # tolerance reflects bf16 operands/probabilities in the MXU matmuls (f32 accum).
    assert jnp.allclose(o1, r1, rtol=2e-2, atol=2e-2), "output 1 mismatch"
    assert jnp.allclose(o2, r2, rtol=2e-2, atol=2e-2), "output 2 mismatch"

    print("KERNEL_OK")
</pallas_src>

<mosaic_0001>
module attributes {stable_mosaic.version = 11 : i64} {
  func.func @_attention_kernel(%arg0: i32, %arg1: memref<1x4x256xf32, #tpu.memory_space<vmem>>, %arg2: memref<1x4x256xf32, #tpu.memory_space<vmem>>, %arg3: memref<2x4x4xf32, #tpu.memory_space<vmem>>, %arg4: memref<2x4x1xf32, #tpu.memory_space<vmem>>, %arg5: memref<2x4x2xf32, #tpu.memory_space<vmem>>, %arg6: memref<2x4x1xf32, #tpu.memory_space<vmem>>, %arg7: memref<1x4x256xf32, #tpu.memory_space<vmem>>, %arg8: memref<1x4x256xf32, #tpu.memory_space<vmem>>, %arg9: memref<3x256xf32, #tpu.memory_space<vmem>>, %arg10: memref<2x256xf32, #tpu.memory_space<vmem>>, %arg11: memref<2x256xbf16, #tpu.memory_space<vmem>>, %arg12: memref<3x256xf32, #tpu.memory_space<vmem>>) attributes {dimension_semantics = [#tpu.dimension_semantics<parallel>], iteration_bounds = array<i64: 2>, scalar_prefetch = 0 : i64, scratch_operands = 4 : i64, tpu.core_type = #tpu.core_type<tc>, window_params = [{transform_indices = @transform_0, window_bounds = array<i64: 1, 4, 256>}, {transform_indices = @transform_1, window_bounds = array<i64: 1, 4, 256>}, {pipeline_mode = #tpu.pipeline_mode<synchronous>, transform_indices = @transform_2, window_bounds = array<i64: 2, 4, 4>}, {pipeline_mode = #tpu.pipeline_mode<synchronous>, transform_indices = @transform_3, window_bounds = array<i64: 2, 4, 1>}, {pipeline_mode = #tpu.pipeline_mode<synchronous>, transform_indices = @transform_4, window_bounds = array<i64: 2, 4, 2>}, {pipeline_mode = #tpu.pipeline_mode<synchronous>, transform_indices = @transform_5, window_bounds = array<i64: 2, 4, 1>}, {transform_indices = @transform_6, window_bounds = array<i64: 1, 4, 256>}, {transform_indices = @transform_7, window_bounds = array<i64: 1, 4, 256>}]} {
    %c0 = arith.constant 0 : index
    %c0_0 = arith.constant 0 : index
    %c0_1 = arith.constant 0 : index
    %0 = vector.load %arg1[%c0, %c0_0, %c0_1] : memref<1x4x256xf32, #tpu.memory_space<vmem>>, vector<1x4x256xf32>
    %1 = vector.shape_cast %0 : vector<1x4x256xf32> to vector<4x256xf32>
    %c0_2 = arith.constant 0 : index
    %c0_3 = arith.constant 0 : index
    %c0_4 = arith.constant 0 : index
    %2 = vector.load %arg2[%c0_2, %c0_3, %c0_4] : memref<1x4x256xf32, #tpu.memory_space<vmem>>, vector<1x4x256xf32>
    %3 = vector.shape_cast %2 : vector<1x4x256xf32> to vector<4x256xf32>
    %c0_5 = arith.constant 0 : index
    %c0_6 = arith.constant 0 : index
    %c0_7 = arith.constant 0 : index
    %4 = vector.load %arg3[%c0_5, %c0_6, %c0_7] : memref<2x4x4xf32, #tpu.memory_space<vmem>>, vector<1x4x4xf32>
    %5 = vector.shape_cast %4 : vector<1x4x4xf32> to vector<4x4xf32>
    %cst = arith.constant dense<0.000000e+00> : vector<4x256xf32>
    %6 = tpu.matmul %5, %1, %cst {dimension_numbers = #tpu.dot_dimension_numbers<[1], [0], [0], [1], [0, 0, 1, 1], [], []>} : vector<4x4xf32>, vector<4x256xf32>, vector<4x256xf32> -> vector<4x256xf32>
    %c0_8 = arith.constant 0 : index
    %c0_9 = arith.constant 0 : index
    %c0_10 = arith.constant 0 : index
    %7 = vector.load %arg4[%c0_8, %c0_9, %c0_10] : memref<2x4x1xf32, #tpu.memory_space<vmem>>, vector<1x4x1xf32>
    %8 = vector.shape_cast %7 : vector<1x4x1xf32> to vector<4x1xf32>
    %9 = vector.broadcast %8 : vector<4x1xf32> to vector<4x256xf32>
    %10 = arith.addf %6, %9 : vector<4x256xf32>
    %c1 = arith.constant 1 : index
    %c0_11 = arith.constant 0 : index
    %c0_12 = arith.constant 0 : index
    %11 = vector.load %arg3[%c1, %c0_11, %c0_12] : memref<2x4x4xf32, #tpu.memory_space<vmem>>, vector<1x4x4xf32>
    %12 = vector.shape_cast %11 : vector<1x4x4xf32> to vector<4x4xf32>
    %cst_13 = arith.constant dense<0.000000e+00> : vector<4x256xf32>
    %13 = tpu.matmul %12, %3, %cst_13 {dimension_numbers = #tpu.dot_dimension_numbers<[1], [0], [0], [1], [0, 0, 1, 1], [], []>} : vector<4x4xf32>, vector<4x256xf32>, vector<4x256xf32> -> vector<4x256xf32>
    %c1_14 = arith.constant 1 : index
    %c0_15 = arith.constant 0 : index
    %c0_16 = arith.constant 0 : index
    %14 = vector.load %arg4[%c1_14, %c0_15, %c0_16] : memref<2x4x1xf32, #tpu.memory_space<vmem>>, vector<1x4x1xf32>
    %15 = vector.shape_cast %14 : vector<1x4x1xf32> to vector<4x1xf32>
    %16 = vector.broadcast %15 : vector<4x1xf32> to vector<4x256xf32>
    %17 = arith.addf %13, %16 : vector<4x256xf32>
    %18 = vector.extract_strided_slice %10 {offsets = [0, 0], sizes = [2, 256], strides = [1, 1]} : vector<4x256xf32> to vector<2x256xf32>
    %19 = vector.extract_strided_slice %10 {offsets = [2, 0], sizes = [2, 256], strides = [1, 1]} : vector<4x256xf32> to vector<2x256xf32>
    %20 = vector.extract_strided_slice %17 {offsets = [0, 0], sizes = [2, 256], strides = [1, 1]} : vector<4x256xf32> to vector<2x256xf32>
    %21 = vector.extract_strided_slice %17 {offsets = [2, 0], sizes = [2, 256], strides = [1, 1]} : vector<4x256xf32> to vector<2x256xf32>
    %cst_17 = arith.constant dense<0.000000e+00> : vector<2x2xf32>
    %22 = tpu.matmul %19, %21, %cst_17 {dimension_numbers = #tpu.dot_dimension_numbers<[1], [1], [0], [0], [0, 0, 1, 0], [], []>} : vector<2x256xf32>, vector<2x256xf32>, vector<2x2xf32> -> vector<2x2xf32>
    %cst_18 = arith.constant dense<0.000000e+00> : vector<2x2xf32>
    %23 = tpu.matmul %21, %19, %cst_18 {dimension_numbers = #tpu.dot_dimension_numbers<[1], [1], [0], [0], [0, 0, 1, 0], [], []>} : vector<2x256xf32>, vector<2x256xf32>, vector<2x2xf32> -> vector<2x2xf32>
    %cst_19 = arith.constant dense<0xFF800000> : vector<2xf32>
    %24 = vector.multi_reduction <maximumf>, %22, %cst_19 [1] : vector<2x2xf32> to vector<2xf32>
    %25 = vector.shape_cast %24 : vector<2xf32> to vector<2x1xf32>
    %26 = vector.broadcast %25 : vector<2x1xf32> to vector<2x2xf32>
    %27 = arith.subf %22, %26 : vector<2x2xf32>
    %28 = math.exp %27 : vector<2x2xf32>
    %cst_20 = arith.constant dense<0.000000e+00> : vector<2xf32>
    %29 = vector.multi_reduction <add>, %28, %cst_20 [1] : vector<2x2xf32> to vector<2xf32>
    %30 = vector.shape_cast %29 : vector<2xf32> to vector<2x1xf32>
    %31 = tpu.reciprocal %30 {approx = true} : vector<2x1xf32> -> vector<2x1xf32>
    %32 = vector.broadcast %31 : vector<2x1xf32> to vector<2x2xf32>
    %33 = arith.mulf %28, %32 : vector<2x2xf32>
    %cst_21 = arith.constant dense<0xFF800000> : vector<2xf32>
    %34 = vector.multi_reduction <maximumf>, %23, %cst_21 [1] : vector<2x2xf32> to vector<2xf32>
    %35 = vector.shape_cast %34 : vector<2xf32> to vector<2x1xf32>
    %36 = vector.broadcast %35 : vector<2x1xf32> to vector<2x2xf32>
    %37 = arith.subf %23, %36 : vector<2x2xf32>
    %38 = math.exp %37 : vector<2x2xf32>
    %cst_22 = arith.constant dense<0.000000e+00> : vector<2xf32>
    %39 = vector.multi_reduction <add>, %38, %cst_22 [1] : vector<2x2xf32> to vector<2xf32>
    %40 = vector.shape_cast %39 : vector<2xf32> to vector<2x1xf32>
    %41 = tpu.reciprocal %40 {approx = true} : vector<2x1xf32> -> vector<2x1xf32>
    %42 = vector.broadcast %41 : vector<2x1xf32> to vector<2x2xf32>
    %43 = arith.mulf %38, %42 : vector<2x2xf32>
    %cst_23 = arith.constant 1.000000e+00 : f32
    %44 = vector.broadcast %cst_23 : f32 to vector<1x256xf32>
    %cst_24 = arith.constant dense<0.000000e+00> : vector<2x256xf32>
    %45 = tpu.matmul %43, %18, %cst_24 {dimension_numbers = #tpu.dot_dimension_numbers<[1], [0], [0], [1], [0, 0, 1, 1], [], []>} : vector<2x2xf32>, vector<2x256xf32>, vector<2x256xf32> -> vector<2x256xf32>
    %46 = tpu.concatenate %45, %44 in 0 : vector<2x256xf32>, vector<1x256xf32> -> vector<3x256xf32>
    %c0_25 = arith.constant 0 : index
    %c0_26 = arith.constant 0 : index
    %47 = vector.load %arg12[%c0_25, %c0_26] : memref<3x256xf32, #tpu.memory_space<vmem>>, vector<3x256xf32>
    tpu.vector_store %arg12[%c0_25, %c0_26], %46 {strides = array<i32>} : memref<3x256xf32, #tpu.memory_space<vmem>>, vector<3x256xf32>,
    %cst_27 = arith.constant dense<0.000000e+00> : vector<2x256xf32>
    %48 = tpu.matmul %33, %20, %cst_27 {dimension_numbers = #tpu.dot_dimension_numbers<[1], [0], [0], [1], [0, 0, 1, 1], [], []>} : vector<2x2xf32>, vector<2x256xf32>, vector<2x256xf32> -> vector<2x256xf32>
    %49 = tpu.concatenate %48, %44 in 0 : vector<2x256xf32>, vector<1x256xf32> -> vector<3x256xf32>
    %50 = arith.truncf %49 : vector<3x256xf32> to vector<3x256xbf16>
    %51 = arith.truncf %19 : vector<2x256xf32> to vector<2x256xbf16>
    %c0_28 = arith.constant 0 : index
    %c0_29 = arith.constant 0 : index
    %52 = vector.load %arg11[%c0_28, %c0_29] : memref<2x256xbf16, #tpu.memory_space<vmem>>, vector<2x256xbf16>
    tpu.vector_store %arg11[%c0_28, %c0_29], %51 {strides = array<i32>} : memref<2x256xbf16, #tpu.memory_space<vmem>>, vector<2x256xbf16>,
    %53 = arith.truncf %21 : vector<2x256xf32> to vector<2x256xbf16>
    %cst_30 = arith.constant 0.000000e+00 : f32
    %54 = vector.broadcast %cst_30 : f32 to vector<3x256xf32>
    %c0_31 = arith.constant 0 : index
    %c0_32 = arith.constant 0 : index
    %55 = vector.load %arg9[%c0_31, %c0_32] : memref<3x256xf32, #tpu.memory_space<vmem>>, vector<3x256xf32>
    tpu.vector_store %arg9[%c0_31, %c0_32], %54 {strides = array<i32>} : memref<3x256xf32, #tpu.memory_space<vmem>>, vector<3x256xf32>,
    %cst_33 = arith.constant -1.000000e+30 : f32
    %56 = vector.broadcast %cst_33 : f32 to vector<1x1xf32>
    %c0_i32 = arith.constant 0 : i32
    %c2_i32 = arith.constant 2 : i32
    %57 = arith.addi %c0_i32, %c2_i32 : i32
    %c1_i32 = arith.constant 1 : i32
    %58 = scf.for %arg13 = %c0_i32 to %57 step %c1_i32 iter_args(%arg14 = %56) -> (vector<1x1xf32>)  : i32 {
      %c128_i32 = arith.constant 128 : i32
      %90 = arith.muli %arg13, %c128_i32 : i32
      %91 = tpu.assume_multiple %90, 128 : i32
      %c0_60 = arith.constant 0 : index
      %92 = arith.index_cast %91 : i32 to index
      %93 = vector.load %arg11[%c0_60, %92] : memref<2x256xbf16, #tpu.memory_space<vmem>>, vector<2x128xbf16>
      %cst_61 = arith.constant dense<0.000000e+00> : vector<128x256xf32>
      %94 = tpu.matmul %93, %53, %cst_61 {dimension_numbers = #tpu.dot_dimension_numbers<[0], [0], [1], [1], [0, 1, 1, 1], [], []>} : vector<2x128xbf16>, vector<2x256xbf16>, vector<128x256xf32> -> vector<128x256xf32>
      %cst_62 = arith.constant dense<0xFF800000> : vector<128xf32>
      %95 = vector.multi_reduction <maximumf>, %94, %cst_62 [1] : vector<128x256xf32> to vector<128xf32>
      %96 = vector.shape_cast %95 : vector<128xf32> to vector<128x1xf32>
      %cst_63 = arith.constant dense<0xFF800000> : vector<1xf32>
      %97 = vector.multi_reduction <maximumf>, %96, %cst_63 [0] : vector<128x1xf32> to vector<1xf32>
      %98 = vector.shape_cast %97 : vector<1xf32> to vector<1x1xf32>
      %99 = arith.maximumf %arg14, %98 : vector<1x1xf32>
      %100 = vector.broadcast %98 : vector<1x1xf32> to vector<128x256xf32>
      %101 = arith.subf %94, %100 : vector<128x256xf32>
      %102 = arith.truncf %101 : vector<128x256xf32> to vector<128x256xbf16>
      %103 = math.exp %102 : vector<128x256xbf16>
      %cst_64 = arith.constant dense<0.000000e+00> : vector<3x128xf32>
      %104 = tpu.matmul %50, %103, %cst_64 {dimension_numbers = #tpu.dot_dimension_numbers<[1], [1], [0], [0], [0, 0, 1, 0], [], []>} : vector<3x256xbf16>, vector<128x256xbf16>, vector<3x128xf32> -> vector<3x128xf32>
      %105 = vector.extract_strided_slice %104 {offsets = [0, 0], sizes = [2, 128], strides = [1, 1]} : vector<3x128xf32> to vector<2x128xf32>
      %106 = vector.extract_strided_slice %104 {offsets = [2, 0], sizes = [1, 128], strides = [1, 1]} : vector<3x128xf32> to vector<1x128xf32>
      %cst_65 = arith.constant 1.000000e-30 : f32
      %107 = vector.broadcast %cst_65 : f32 to vector<1x128xf32>
      %108 = arith.maximumf %106, %107 : vector<1x128xf32>
      %109 = tpu.reciprocal %108 {approx = true} : vector<1x128xf32> -> vector<1x128xf32>
      %110 = vector.broadcast %109 : vector<1x128xf32> to vector<2x128xf32>
      %111 = arith.mulf %105, %110 : vector<2x128xf32>
      %c0_66 = arith.constant 0 : index
      %112 = arith.index_cast %91 : i32 to index
      %113 = vector.load %arg10[%c0_66, %112] : memref<2x256xf32, #tpu.memory_space<vmem>>, vector<2x128xf32>
      tpu.vector_store %arg10[%c0_66, %112], %111 {strides = array<i32>} : memref<2x256xf32, #tpu.memory_space<vmem>>, vector<2x128xf32>,
      %c0_67 = arith.constant 0 : index
      %114 = arith.index_cast %91 : i32 to index
      %115 = vector.load %arg12[%c0_67, %114] : memref<3x256xf32, #tpu.memory_space<vmem>>, vector<3x128xf32>
      %116 = arith.subf %98, %99 : vector<1x1xf32>
      %117 = math.exp %116 : vector<1x1xf32>
      %118 = arith.subf %arg14, %99 : vector<1x1xf32>
      %119 = math.exp %118 : vector<1x1xf32>
      %120 = vector.broadcast %117 : vector<1x1xf32> to vector<3x128xf32>
      %121 = arith.mulf %115, %120 : vector<3x128xf32>
      %122 = arith.truncf %121 : vector<3x128xf32> to vector<3x128xbf16>
      %cst_68 = arith.constant dense<0.000000e+00> : vector<3x256xf32>
      %123 = tpu.matmul %122, %103, %cst_68 {dimension_numbers = #tpu.dot_dimension_numbers<[1], [0], [0], [1], [0, 0, 1, 1], [], []>} : vector<3x128xbf16>, vector<128x256xbf16>, vector<3x256xf32> -> vector<3x256xf32>
      %c0_69 = arith.constant 0 : index
      %c0_70 = arith.constant 0 : index
      %124 = vector.load %arg9[%c0_69, %c0_70] : memref<3x256xf32, #tpu.memory_space<vmem>>, vector<3x256xf32>
      %125 = vector.broadcast %119 : vector<1x1xf32> to vector<3x256xf32>
      %126 = arith.mulf %124, %125 : vector<3x256xf32>
      %127 = arith.addf %126, %123 : vector<3x256xf32>
      %c0_71 = arith.constant 0 : index
      %c0_72 = arith.constant 0 : index
      %128 = vector.load %arg9[%c0_71, %c0_72] : memref<3x256xf32, #tpu.memory_space<vmem>>, vector<3x256xf32>
      tpu.vector_store %arg9[%c0_71, %c0_72], %127 {strides = array<i32>} : memref<3x256xf32, #tpu.memory_space<vmem>>, vector<3x256xf32>,
      scf.yield %99 : vector<1x1xf32>
    }
    %c2_i32_34 = arith.constant 2 : i32
    %c0_35 = arith.constant 0 : index
    %c0_36 = arith.constant 0 : index
    %59 = vector.load %arg9[%c0_35, %c0_36] : memref<3x256xf32, #tpu.memory_space<vmem>>, vector<3x256xf32>
    %60 = vector.extract_strided_slice %59 {offsets = [0, 0], sizes = [2, 256], strides = [1, 1]} : vector<3x256xf32> to vector<2x256xf32>
    %61 = vector.extract_strided_slice %59 {offsets = [2, 0], sizes = [1, 256], strides = [1, 1]} : vector<3x256xf32> to vector<1x256xf32>
    %cst_37 = arith.constant 1.000000e-30 : f32
    %62 = vector.broadcast %cst_37 : f32 to vector<1x256xf32>
    %63 = arith.maximumf %61, %62 : vector<1x256xf32>
    %64 = tpu.reciprocal %63 {approx = true} : vector<1x256xf32> -> vector<1x256xf32>
    %65 = vector.broadcast %64 : vector<1x256xf32> to vector<2x256xf32>
    %66 = arith.mulf %60, %65 : vector<2x256xf32>
    %c0_38 = arith.constant 0 : index
    %c0_39 = arith.constant 0 : index
    %c0_40 = arith.constant 0 : index
    %67 = vector.load %arg5[%c0_38, %c0_39, %c0_40] : memref<2x4x2xf32, #tpu.memory_space<vmem>>, vector<1x4x2xf32>
    %68 = vector.shape_cast %67 : vector<1x4x2xf32> to vector<4x2xf32>
    %cst_41 = arith.constant dense<0.000000e+00> : vector<4x256xf32>
    %69 = tpu.matmul %68, %66, %cst_41 {dimension_numbers = #tpu.dot_dimension_numbers<[1], [0], [0], [1], [0, 0, 1, 1], [], []>} : vector<4x2xf32>, vector<2x256xf32>, vector<4x256xf32> -> vector<4x256xf32>
    %70 = arith.addf %1, %69 : vector<4x256xf32>
    %c0_42 = arith.constant 0 : index
    %c0_43 = arith.constant 0 : index
    %c0_44 = arith.constant 0 : index
    %71 = vector.load %arg6[%c0_42, %c0_43, %c0_44] : memref<2x4x1xf32, #tpu.memory_space<vmem>>, vector<1x4x1xf32>
    %72 = vector.shape_cast %71 : vector<1x4x1xf32> to vector<4x1xf32>
    %73 = vector.broadcast %72 : vector<4x1xf32> to vector<4x256xf32>
    %74 = arith.addf %70, %73 : vector<4x256xf32>
    %c0_45 = arith.constant 0 : index
    %c0_46 = arith.constant 0 : index
    %c0_47 = arith.constant 0 : index
    %75 = vector.load %arg7[%c0_45, %c0_46, %c0_47] : memref<1x4x256xf32, #tpu.memory_space<vmem>>, vector<1x4x256xf32>
    %76 = vector.shape_cast %75 : vector<1x4x256xf32> to vector<4x256xf32>
    %77 = vector.shape_cast %74 : vector<4x256xf32> to vector<1x4x256xf32>
    tpu.vector_store %arg7[%c0_45, %c0_46, %c0_47], %77 {strides = array<i32>} : memref<1x4x256xf32, #tpu.memory_space<vmem>>, vector<1x4x256xf32>,
    %c0_48 = arith.constant 0 : index
    %c0_49 = arith.constant 0 : index
    %78 = vector.load %arg10[%c0_48, %c0_49] : memref<2x256xf32, #tpu.memory_space<vmem>>, vector<2x256xf32>
    %c1_50 = arith.constant 1 : index
    %c0_51 = arith.constant 0 : index
    %c0_52 = arith.constant 0 : index
    %79 = vector.load %arg5[%c1_50, %c0_51, %c0_52] : memref<2x4x2xf32, #tpu.memory_space<vmem>>, vector<1x4x2xf32>
    %80 = vector.shape_cast %79 : vector<1x4x2xf32> to vector<4x2xf32>
    %cst_53 = arith.constant dense<0.000000e+00> : vector<4x256xf32>
    %81 = tpu.matmul %80, %78, %cst_53 {dimension_numbers = #tpu.dot_dimension_numbers<[1], [0], [0], [1], [0, 0, 1, 1], [], []>} : vector<4x2xf32>, vector<2x256xf32>, vector<4x256xf32> -> vector<4x256xf32>
    %82 = arith.addf %3, %81 : vector<4x256xf32>
    %c1_54 = arith.constant 1 : index
    %c0_55 = arith.constant 0 : index
    %c0_56 = arith.constant 0 : index
    %83 = vector.load %arg6[%c1_54, %c0_55, %c0_56] : memref<2x4x1xf32, #tpu.memory_space<vmem>>, vector<1x4x1xf32>
    %84 = vector.shape_cast %83 : vector<1x4x1xf32> to vector<4x1xf32>
    %85 = vector.broadcast %84 : vector<4x1xf32> to vector<4x256xf32>
    %86 = arith.addf %82, %85 : vector<4x256xf32>
    %c0_57 = arith.constant 0 : index
    %c0_58 = arith.constant 0 : index
    %c0_59 = arith.constant 0 : index
    %87 = vector.load %arg8[%c0_57, %c0_58, %c0_59] : memref<1x4x256xf32, #tpu.memory_space<vmem>>, vector<1x4x256xf32>
    %88 = vector.shape_cast %87 : vector<1x4x256xf32> to vector<4x256xf32>
    %89 = vector.shape_cast %86 : vector<4x256xf32> to vector<1x4x256xf32>
    tpu.vector_store %arg8[%c0_57, %c0_58, %c0_59], %89 {strides = array<i32>} : memref<1x4x256xf32, #tpu.memory_space<vmem>>, vector<1x4x256xf32>,
    return
  }
  func.func @transform_0(%arg0: i32) -> (i32, i32, i32) {
    %c0_i32 = arith.constant 0 : i32
    %c0_i32_0 = arith.constant 0 : i32
    %c0_i32_1 = arith.constant 0 : i32
    return %arg0, %c0_i32, %c0_i32_0 : i32, i32, i32
  }
  func.func @transform_1(%arg0: i32) -> (i32, i32, i32) {
    %c0_i32 = arith.constant 0 : i32
    %c0_i32_0 = arith.constant 0 : i32
    %c0_i32_1 = arith.constant 0 : i32
    return %arg0, %c0_i32, %c0_i32_0 : i32, i32, i32
  }
  func.func @transform_2(%arg0: i32) -> (i32, i32, i32) {
    %c0_i32 = arith.constant 0 : i32
    %c0_i32_0 = arith.constant 0 : i32
    %c0_i32_1 = arith.constant 0 : i32
    %c0_i32_2 = arith.constant 0 : i32
    return %c0_i32, %c0_i32_0, %c0_i32_1 : i32, i32, i32
  }
  func.func @transform_3(%arg0: i32) -> (i32, i32, i32) {
    %c0_i32 = arith.constant 0 : i32
    %c0_i32_0 = arith.constant 0 : i32
    %c0_i32_1 = arith.constant 0 : i32
    %c0_i32_2 = arith.constant 0 : i32
    return %c0_i32, %c0_i32_0, %c0_i32_1 : i32, i32, i32
  }
  func.func @transform_4(%arg0: i32) -> (i32, i32, i32) {
    %c0_i32 = arith.constant 0 : i32
    %c0_i32_0 = arith.constant 0 : i32
    %c0_i32_1 = arith.constant 0 : i32
    %c0_i32_2 = arith.constant 0 : i32
    return %c0_i32, %c0_i32_0, %c0_i32_1 : i32, i32, i32
  }
  func.func @transform_5(%arg0: i32) -> (i32, i32, i32) {
    %c0_i32 = arith.constant 0 : i32
    %c0_i32_0 = arith.constant 0 : i32
    %c0_i32_1 = arith.constant 0 : i32
    %c0_i32_2 = arith.constant 0 : i32
    return %c0_i32, %c0_i32_0, %c0_i32_1 : i32, i32, i32
  }
  func.func @transform_6(%arg0: i32) -> (i32, i32, i32) {
    %c0_i32 = arith.constant 0 : i32
    %c0_i32_0 = arith.constant 0 : i32
    %c0_i32_1 = arith.constant 0 : i32
    return %arg0, %c0_i32, %c0_i32_0 : i32, i32, i32
  }
  func.func @transform_7(%arg0: i32) -> (i32, i32, i32) {
    %c0_i32 = arith.constant 0 : i32
    %c0_i32_0 = arith.constant 0 : i32
    %c0_i32_1 = arith.constant 0 : i32
    return %arg0, %c0_i32, %c0_i32_0 : i32, i32, i32
  }
}

</mosaic_0001>

<bundles_post_ra>
// kernel: spatiotemporal_attention.1
= control target key start
LH: loop header
LB: loop body
LE: loop exit
PB: predicated region body
PF: predicated region fallthrough
CT: control target
= control target key end

     0   :  { %s1872_s24 = smov 0   ;;  %s2220_s0 = inlined_call_operand.vmem [shape: f32[2,4,256], index: 0, kind: input, shape index: {}]   ;;  %s2221_s1 = inlined_call_operand.vmem [shape: f32[2,4,256], index: 1, kind: input, shape index: {}]   ;;  %s2222_s2 = inlined_call_operand.vmem [shape: f32[2,4,4], index: 2, kind: input, shape index: {}]   ;;  %s2223_s3 = inlined_call_operand.vmem [shape: f32[2,4,1], index: 3, kind: input, shape index: {}]   ;;  %s2224_s4 = inlined_call_operand.vmem [shape: f32[2,4,2], index: 4, kind: input, shape index: {}]   ;;  %s2225_s5 = inlined_call_operand.vmem [shape: f32[2,4,1], index: 5, kind: input, shape index: {}]   ;;  %s2226_s6 = inlined_call_operand.vmem [shape: f32[2,4,256], index: 6, kind: output, shape index: {0}]   ;;  %s2227_s7 = inlined_call_operand.vmem [shape: f32[2,4,256], index: 7, kind: output, shape index: {1}]  }
   0x1 LB: > { %s1666_s25 = sadd.s32 4294967295, %s1817_s24   ;;  %p1670_p0 = scmp.ge.s32.totalorder %s1817_s24, 1  ;;  %s1817_s24 = sphi %s1872_s24, %s18_s24  }
   0x2   : > { %p250_p1 = scmp.lt.s32.totalorder %s1817_s24, 3 }
   0x4   : > { %p251_p2 = pnand %p1670_p0, %p250_p1 }
   0x6   : > { %254 = sbr.rel (%p251_p2) target bundleno = 2082 (0x822), region = 44 }
   0xd   : > { %p292_p3 = scmp.lt.s32.totalorder %s1666_s25, 1  ;;  %v2229_v0 = vmov 0.0   ;;  %v316_v1 = vld [vmem:[%s2223_s3] sm:$0xf]  ;;  %v2228_v2 = vmov 0   ;;  %vm328_vm0 = vcmask 1043456   ;;  %v845_v13 = vlaneseq }
   0xe   : > { %397 = vmatprep.mubr.f32.mxu0 %v2229_v0  ;;  %861 = vst [vmem:[#allocation2] sm:$0x77] %v2229_v0  ;;  %486 = vmatprep.mubr.f32.mxu1 %v2229_v0  ;;  %v1683_v3 = vld [vmem:[%s2223_s3 + $0x4] sm:$0xf]  ;;  %v315_v8 = vld [vmem:[%s2222_s2] sm:$0xf] }
   0xf   : > { %s2271_s25 = smov (!%p292_p3, %s1666_s25), 1  ;;  %1751 = vset.pattern.permute.xlu0 %v2228_v2  ;;  %vm324_vm1 = vcmask 31744   ;;  %v1682_v9 = vld [vmem:[%s2222_s2 + $0x4] sm:$0xf]  ;;  %v1829_v11 = vmov 1966171168  }
  0x10   : > { %319 = vperm.xlu0 %1751, %v316_v1   ;;  %s1887_s28 = sshll.u32 %s2271_s25, 3  ;;  %v843_v12 = vunpack.c.l.s4 %v1829_v11  ;;  %v1924_v15 = vshrl.u32 %v845_v13, 7  ;;  %vm672_vm2 = vcmask 1041408   ;;  %vm645_vm3 = vcmask 9216   ;;  %s1965_s25 = smov 0  }
  0x11   : > { %s296_s10 = scalar_lea.vmem %s2220_s0, %s1887_s28  ;;  %s306_s13 = scalar_lea.vmem %s2226_s6, %s1887_s28  ;;  %vm668_vm4 = vcmask 15360  }
  0x12   : > { %s311_s16 = scalar_lea.vmem %s2227_s7, %s1887_s28  ;;  %v1904_v4 = vld [vmem:[%s296_s10] sm:$0xff]  ;;  %s301_s19 = scalar_lea.vmem %s2221_s1, %s1887_s28  ;;  %v844_v14 = vunpack.c.0.s8 %v843_v12  ;;  %2247 = vst [vmem:[#allocation8_spill] sm:$0xff] %v1924_v15 }
  0x13   : > { %2245 = vst [vmem:[#allocation6_spill] sm:$0xff] %v1904_v4  ;;  %v323_v5 = vcombine.high %v1904_v4, %v1904_v4  ;;  %v1912_v6 = vld [vmem:[%s301_s19] sm:$0xff] }
  0x14   : > { %2246 = vst [vmem:[#allocation7_spill] sm:$0xff] %v1912_v6  ;;  %410 = vperm.xlu0 %1751, %v1683_v3   ;;  %v414_v7 = vcombine.high %v1912_v6, %v1912_v6  ;;  %v847_v23 = vsub.s32 %v844_v14, %v1924_v15 }
  0x15   : > { %1679 = vmatprep.subr.msk.mxu0 %vm328_vm0, %v323_v5 }
  0x16   : > { %1684 = vmatprep.subr.msk.mxu1 %vm328_vm0, %v414_v7  ;;  %1680 = vmatpush1.msk.msra.mxu0 %vm328_vm0, %v1904_v4 }
  0x17   : > { %1685 = vmatpush1.msk.msra.mxu1 %vm328_vm0, %v1912_v6  ;;  %1681 = vmatmul.mubr.msk.f32.vlgmr.msra.gmra.mrb[0].mxu0 %vm324_vm1, %v315_v8  ;;  %v1963_v8 = vmov -1e+30  }
  0x18   : > { %1686 = vmatmul.mubr.msk.f32.vlgmr.msra.gmra.mrb[0].mxu1 %vm324_vm1, %v1682_v9 }
  0x8f   : > { %v320_v10 = vpop.permute.xlu0 %319 }
  0x93   : > { %v411_v16 = vpop.permute.xlu0 %410 }
  0xea   : > { %v399_v17 = vpop.f32.mrb[0].mxu0 }
  0xeb   : > { %v400_v18 = vadd.f32 %v399_v17, %v320_v10  ;;  %v488_v19 = vpop.f32.mrb[0].mxu1  ;;  %v401_v20 = vpop.f32.mrb[1].mxu0 }
  0xec   : > { %v1926_v21 = vadd.f32 %v488_v19, %v411_v16  ;;  %v402_v22 = vadd.f32 %v401_v20, %v320_v10  ;;  %v490_v24 = vpop.f32.mrb[1].mxu1 }
  0xed   : > { %v1929_v25 = vadd.f32 %v490_v24, %v411_v16  ;;  %v495_v31 = vrot.slane %v400_v18, 2 }
  0xee   : > { %2248 = vst [vmem:[#allocation9_spill] sm:$0xff] %v1926_v21  ;;  %v1693_v27 = vpack.c.bf16 %v402_v22, %v400_v18  ;;  %v496_v28 = vrot.slane %v402_v22, 2  ;;  %v501_v32 = vrot.slane %v1926_v21, 2 }
  0xef   : > { %2249 = vst [vmem:[#allocation10_spill] sm:$0xff] %v1929_v25  ;;  %v502_v30 = vrot.slane %v1929_v25, 2 }
  0xf0   : > { %v848_v33 = vrot.slane %v1693_v27, %v847_v23  ;;  %569 = vmatprep.mubr.f32.mxu0 %v496_v28  ;;  %575 = vmatprep.subr.mxu1 %v496_v28 }
  0xf1   : > { %505 = vmatprep.subr.mxu0 %v502_v30  ;;  %639 = vmatprep.mubr.f32.mxu1 %v502_v30 }
  0xf2   : > { %v849_v34 = vcombine.high %v848_v33, %v848_v33  ;;  %506 = vmatpush1.xpose.msra.mxu0 %v501_v32  ;;  %576 = vmatpush1.xpose.msra.mxu1 %v495_v31 }
  0xf3   : > { %1687 = vmatprep.subr.msk.mxu0 %vm672_vm2, %v402_v22  ;;  %1690 = vmatprep.subr.msk.mxu1 %vm672_vm2, %v1929_v25 }
  0xf4   : > { %1694 = vst.sshfl [vmem:[#allocation4] sm:$0x5 pattern:$0x73625140] %v849_v34 }
  0xf5   : > { %570 = vmatmul.mubr.f32.vlgmr.msra.gmra.mrb[2].mxu0 %v495_v31  ;;  %640 = vmatmul.mubr.f32.vlgmr.msra.gmra.mrb[2].mxu1 %v501_v32 }
  0xf6   : > { %1688 = vmatpush1.msk.msra.mxu0 %vm672_vm2, %v400_v18  ;;  %1691 = vmatpush1.msk.msra.mxu1 %vm672_vm2, %v1926_v21 }
  0xf7   : > { %741 = vmatprep.mubr.f32.mxu0 %v2229_v0  ;;  %826 = vmatprep.mubr.f32.mxu1 %v2229_v0 }
 0x1c8   : > { %v571_v35 = vpop.f32.mrb[2].mxu0  ;;  %v641_v36 = vpop.f32.mrb[2].mxu1 }
 0x1c9   : > { %v573_v37 = vpop.f32.mrb[3].mxu0  ;;  %v643_v38 = vpop.f32.mrb[3].mxu1  ;;  %v657_v39 = vsel %vm645_vm3, %v641_v36, -inf  ;;  %v646_v40 = vsel %vm645_vm3, %v571_v35, -inf }
 0x1ca   : > { %658 = vmax.xlane.f32.xlu1 %v657_v39 }
 0x1ce   : > { %647 = vmax.xlane.f32.xlu1 %v646_v40 }
 0x257   : > { %v659_v41 = vpop.xlane.xlu1 %658 }
 0x258   : > { %v660_v42 = vsub.f32 %v641_v36, %v659_v41 }
 0x25a   : > { %v661_v43 = vmul.f32 1.442695, %v660_v42 }
 0x25b   : > { %v648_v44 = vpop.xlane.xlu1 %647 }
 0x25c   : > { %1754 = vpow2.f32 %v661_v43  ;;  %v649_v45 = vsub.f32 %v571_v35, %v648_v44 }
 0x25e   : > { %v650_v46 = vmul.f32 1.442695, %v649_v45 }
 0x260   : > { %1756 = vpow2.f32 %v650_v46 }
 0x266   : > { %v1755_v47 = vpop.eup %1754 }
 0x267   : > { %v663_v48 = vsel %vm645_vm3, %v1755_v47, 0.0 }
 0x268   : > { %664 = vadd.xlane.f32.xlu0 %v663_v48 }
 0x26a   : > { %v1757_v49 = vpop.eup %1756 }
 0x26b   : > { %v652_v50 = vsel %vm645_vm3, %v1757_v49, 0.0 }
 0x26c   : > { %653 = vadd.xlane.f32.xlu1 %v652_v50 }
 0x2f5   : > { %v665_v51 = vpop.xlane.xlu0 %664 }
 0x2f6   : > { %1758 = vrcp.f32 %v665_v51 }
 0x2f9   : > { %v654_v52 = vpop.xlane.xlu1 %653 }
 0x2fa   : > { %1760 = vrcp.f32 %v654_v52 }
 0x300   : > { %v1759_v53 = vpop.eup %1758 }
 0x301   : > { %v667_v54 = vmul.f32 %v1759_v53, %v1755_v47 }
 0x303   : > { %1689 = vmatmul.mubr.msk.f32.vlgmr.msra.gmra.mrb[4].mxu0 %vm668_vm4, %v667_v54 }
 0x304   : > { %v1761_v55 = vpop.eup %1760 }
 0x305   : > { %v656_v56 = vmul.f32 %v1761_v55, %v1757_v49 }
 0x307   : > { %1692 = vmatmul.mubr.msk.f32.vlgmr.msra.gmra.mrb[4].mxu1 %vm668_vm4, %v656_v56 }
 0x3d6   : > { %v743_v57 = vpop.f32.mrb[4].mxu0 }
 0x3d7   : > { %v748_v58 = vsel %vm672_vm2, %v743_v57, 1.0  ;;  %v745_v59 = vpop.f32.mrb[5].mxu0 }
 0x3d8   : > { %v749_v60 = vsel %vm672_vm2, %v745_v59, 1.0 }
 0x3d9   : > { %v752_v61 = vcombine.low %v748_v58, %v749_v60 }
 0x3da   : > { %v828_v62 = vpop.f32.mrb[4].mxu1 }
 0x3db   : > { %754 = vst [vmem:[#allocation5] sm:$0x77] %v752_v61  ;;  %v1954_v63 = vsel %vm672_vm2, %v828_v62, 1.0  ;;  %v830_v1 = vpop.f32.mrb[5].mxu1 }
 0x3dc   : > { %2250 = vst [vmem:[#allocation11_spill] sm:$0xff] %v1954_v63  ;;  %v1959_v5 = vsel %vm672_vm2, %v830_v1, 1.0 }
 0x3dd   : > { %2251 = vst [vmem:[#allocation12_spill] sm:$0xff] %v1959_v5 }
 0x3de LB: >> { %v2252_v25 = vld [vmem:[#allocation10_spill] sm:$0xff]  ;;  %v2253_v21 = vld [vmem:[#allocation9_spill] sm:$0xff]  ;;  %2255 = vst [vmem:[#allocation13_spill] sm:$0xff] %v1821_v8  ;;  %vm918_vm5 = vcmask 1040384   ;;  %s1695_s26 = sshll.u32 %s1825_s25, 7  ;;  %v1830_v12 = vmov 0   ;;  %v1821_v8 = vphi %v1963_v8, %v2160_v8   ;;  %s1825_s25 = sphi %s1965_s25, %s867_s25  }
 0x3df   : >> { %v2256_v29 = vpack.c.bf16 %v2252_v25, %v2252_v25  ;;  %v2257_v26 = vpack.c.bf16 %v2253_v21, %v2253_v21  ;;  %957 = vmatprep.mubr.bf16.mxu0 %v1830_v12  ;;  %s1983_s27 = sshra.s32 %s1695_s26, 7  ;;  %s867_s25 = sadd.s32 1, %s1825_s25  }
 0x3e0   : >> { %s872_s29 = scalar_lea.vmem [#allocation4], %s1983_s27  ;;  %s1706_s30 = sshll.u32 %s1983_s27, 2 }
 0x3e1   : >> { %v893_v9 = vrot.slane %v2256_v29, 1  ;;  %v892_v10 = vrot.slane %v2257_v26, 1  ;;  %v873_v13 = vld [vmem:[%s872_s29] sm:$0x1]  ;;  %s1255_s8 = scalar_lea.vmem [#allocation5], %s1706_s30  ;;  %s1705_s9 = sshll.u32 %s1983_s27, 1 }
 0x3e2   : >> { %874 = vxpose.xlu0.c.b16.start.end [1/1] (short) %v873_v13, 128  ;;  %s1252_s10 = scalar_lea.vmem [#allocation3], %s1705_s9  ;;  %p864_p4 = scmp.ge.s32.totalorder %s867_s25, 2  }
 0x3e3   : >> { %1696 = vmatprep.subr.msk.bf16.mxu0 %vm918_vm5, %v893_v9  ;;  %v920_v11 = vsel %vm918_vm5, %v892_v10, 0 }
 0x3e4   : >> { %v2254_v5 = vld [vmem:[#allocation12_spill] sm:$0xff]  ;;  %926 = vmatpush1.bf16.msra.mxu0 %v920_v11 }
 0x3e5   : >> { %v2258_v7 = vpack.c.bf16 %v2254_v5, %v2254_v5 }
 0x3e7   : >> { %1236 = vmatprep.mubr.bf16.mxu1 %v2258_v7 }
 0x448   : >> { %v882_v14 = vpop.trf.xlu0 }
 0x449   : >> { %1697 = vmatmul.mubr.msk.bf16.vlgmr.msra.gmra.mrb[0].mxu0 %vm668_vm4, %v882_v14 }
 0x44a   : >> { %967 = vmatprep.mubr.bf16.mxu0 %v1830_v12 }
 0x44c   : >> { %v883_v16 = vpop.trf.xlu0 }
 0x450   : >> { %v884_v17 = vpop.trf.xlu0 }
 0x451   : >> { %1698 = vmatmul.mubr.msk.bf16.gmra.mrb[4].mxu0 %vm668_vm4, %v883_v16 }
 0x452   : >> { %977 = vmatprep.mubr.bf16.mxu0 %v1830_v12 }
 0x454   : >> { %v885_v18 = vpop.trf.xlu0 }
 0x458   : >> { %v886_v19 = vpop.trf.xlu0 }
 0x459   : >> { %1699 = vmatmul.mubr.msk.bf16.gmra.mrb[8].mxu0 %vm668_vm4, %v884_v17 }
 0x45a   : >> { %987 = vmatprep.mubr.bf16.mxu0 %v1830_v12 }
 0x45c   : >> { %v887_v20 = vpop.trf.xlu0 }
 0x460   : >> { %v888_v22 = vpop.trf.xlu0 }
 0x461   : >> { %1700 = vmatmul.mubr.msk.bf16.gmra.mrb[12].mxu0 %vm668_vm4, %v885_v18 }
 0x462   : >> { %997 = vmatprep.mubr.bf16.mxu0 %v1830_v12 }
 0x464   : >> { %v889_v23 = vpop.trf.xlu0 }
 0x469   : >> { %1701 = vmatmul.mubr.msk.bf16.gmra.mrb[16].mxu0 %vm668_vm4, %v886_v19 }
 0x46a   : >> { %1007 = vmatprep.mubr.bf16.mxu0 %v1830_v12 }
 0x471   : >> { %1702 = vmatmul.mubr.msk.bf16.gmra.mrb[20].mxu0 %vm668_vm4, %v887_v20 }
 0x472   : >> { %1017 = vmatprep.mubr.bf16.mxu0 %v1830_v12 }
 0x479   : >> { %1703 = vmatmul.mubr.msk.bf16.gmra.mrb[24].mxu0 %vm668_vm4, %v888_v22 }
 0x47a   : >> { %1027 = vmatprep.mubr.bf16.mxu0 %v1830_v12 }
 0x481   : >> { %1704 = vmatmul.mubr.msk.bf16.gmra.mrb[28].mxu0 %vm668_vm4, %v889_v23 }
 0x482   : >> { %1297 = vmatprep.mubr.bf16.mxu0 %v1830_v12 }
 0x51c   : >> { %v1994_v24 = vpop.f32.mrb[0].mxu0 }
 0x51d   : >> { %v1996_v27 = vpop.f32.mrb[1].mxu0 }
 0x51e   : >> { %v1998_v28 = vpop.f32.mrb[2].mxu0  ;;  %v1038_v30 = vmax.f32 %v1994_v24, %v1996_v27 }
 0x51f   : >> { %v2002_v31 = vpop.f32.mrb[3].mxu0 }
 0x520   : >> { %1039 = vmax.xlane.f32.xlu0 %v1038_v30  ;;  %v1041_v32 = vmax.f32 %v1998_v28, %v2002_v31 }
 0x522   : >> { %1042 = vmax.xlane.f32.xlu1 %v1041_v32 }
 0x524   : >> { %v2006_v33 = vpop.f32.mrb[4].mxu0 }
 0x525   : >> { %v2008_v34 = vpop.f32.mrb[5].mxu0 }
 0x526   : >> { %v2010_v35 = vpop.f32.mrb[6].mxu0  ;;  %v1044_v36 = vmax.f32 %v2006_v33, %v2008_v34 }
 0x527   : >> { %v2014_v37 = vpop.f32.mrb[7].mxu0 }
 0x528   : >> { %1045 = vmax.xlane.f32.xlu1 %v1044_v36  ;;  %v1047_v38 = vmax.f32 %v2010_v35, %v2014_v37 }
 0x52c   : >> { %1048 = vmax.xlane.f32.xlu1 %v1047_v38  ;;  %v2018_v39 = vpop.f32.mrb[8].mxu0 }
 0x52d   : >> { %v2020_v40 = vpop.f32.mrb[9].mxu0 }
 0x52e   : >> { %v2022_v41 = vpop.f32.mrb[10].mxu0  ;;  %v1050_v42 = vmax.f32 %v2018_v39, %v2020_v40 }
 0x52f   : >> { %v2026_v43 = vpop.f32.mrb[11].mxu0 }
 0x530   : >> { %1051 = vmax.xlane.f32.xlu1 %v1050_v42  ;;  %v1053_v44 = vmax.f32 %v2022_v41, %v2026_v43 }
 0x534   : >> { %1054 = vmax.xlane.f32.xlu1 %v1053_v44  ;;  %v2030_v45 = vpop.f32.mrb[12].mxu0 }
 0x535   : >> { %v2032_v46 = vpop.f32.mrb[13].mxu0 }
 0x536   : >> { %v2034_v47 = vpop.f32.mrb[14].mxu0  ;;  %v1056_v48 = vmax.f32 %v2030_v45, %v2032_v46 }
 0x537   : >> { %v2038_v49 = vpop.f32.mrb[15].mxu0 }
 0x538   : >> { %1057 = vmax.xlane.f32.xlu1 %v1056_v48  ;;  %v1059_v50 = vmax.f32 %v2034_v47, %v2038_v49 }
 0x53c   : >> { %1060 = vmax.xlane.f32.xlu1 %v1059_v50  ;;  %v2042_v51 = vpop.f32.mrb[16].mxu0 }
 0x53d   : >> { %v2044_v52 = vpop.f32.mrb[17].mxu0 }
 0x53e   : >> { %v2046_v53 = vpop.f32.mrb[18].mxu0  ;;  %v1062_v54 = vmax.f32 %v2042_v51, %v2044_v52 }
 0x53f   : >> { %v2050_v55 = vpop.f32.mrb[19].mxu0 }
 0x540   : >> { %1063 = vmax.xlane.f32.xlu1 %v1062_v54  ;;  %v1065_v56 = vmax.f32 %v2046_v53, %v2050_v55 }
 0x544   : >> { %1066 = vmax.xlane.f32.xlu1 %v1065_v56  ;;  %v2054_v57 = vpop.f32.mrb[20].mxu0 }
 0x545   : >> { %v2056_v58 = vpop.f32.mrb[21].mxu0 }
 0x546   : >> { %v2058_v59 = vpop.f32.mrb[22].mxu0  ;;  %v1068_v60 = vmax.f32 %v2054_v57, %v2056_v58 }
 0x547   : >> { %v2062_v61 = vpop.f32.mrb[23].mxu0 }
 0x548   : >> { %1069 = vmax.xlane.f32.xlu1 %v1068_v60  ;;  %v1071_v62 = vmax.f32 %v2058_v59, %v2062_v61 }
 0x54c   : >> { %1072 = vmax.xlane.f32.xlu1 %v1071_v62  ;;  %v2066_v1 = vpop.f32.mrb[24].mxu0 }
 0x54d   : >> { %v2068_v9 = vpop.f32.mrb[25].mxu0 }
 0x54e   : >> { %v2070_v10 = vpop.f32.mrb[26].mxu0  ;;  %v1074_v11 = vmax.f32 %v2066_v1, %v2068_v9 }
 0x54f   : >> { %v2074_v12 = vpop.f32.mrb[27].mxu0 }
 0x550   : >> { %1075 = vmax.xlane.f32.xlu1 %v1074_v11  ;;  %v1077_v13 = vmax.f32 %v2070_v10, %v2074_v12 }
 0x552   : >> { %1078 = vmax.xlane.f32.xlu0 %v1077_v13 }
 0x554   : >> { %v2078_v14 = vpop.f32.mrb[28].mxu0 }
 0x555   : >> { %v2080_v16 = vpop.f32.mrb[29].mxu0 }
 0x556   : >> { %v2082_v17 = vpop.f32.mrb[30].mxu0  ;;  %v1080_v18 = vmax.f32 %v2078_v14, %v2080_v16 }
 0x557   : >> { %v2086_v19 = vpop.f32.mrb[31].mxu0 }
 0x558   : >> { %2259 = vst [vmem:[#allocation14_spill] sm:$0xff] %v2086_v19  ;;  %1081 = vmax.xlane.f32.xlu1 %v1080_v18  ;;  %v1083_v20 = vmax.f32 %v2082_v17, %v2086_v19 }
 0x55a   : >> { %1084 = vmax.xlane.f32.xlu0 %v1083_v20 }
 0x5ad   : >> { %v1040_v56 = vpop.xlane.xlu0 %1039 }
 0x5af   : >> { %v1043_v22 = vpop.xlane.xlu1 %1042 }
 0x5b5   : >> { %v1046_v23 = vpop.xlane.xlu1 %1045 }
 0x5b9   : >> { %v1049_v30 = vpop.xlane.xlu1 %1048 }
 0x5bd   : >> { %v1052_v32 = vpop.xlane.xlu1 %1051 }
 0x5be   : >> { %v1086_v13 = vmax.f32 %v1040_v56, %v1052_v32 }
 0x5c1   : >> { %v1055_v36 = vpop.xlane.xlu1 %1054 }
 0x5c2   : >> { %v1087_v62 = vmax.f32 %v1043_v22, %v1055_v36 }
 0x5c5   : >> { %v1058_v38 = vpop.xlane.xlu1 %1057 }
 0x5c6   : >> { %v1088_v18 = vmax.f32 %v1046_v23, %v1058_v38 }
 0x5c9   : >> { %v1061_v42 = vpop.xlane.xlu1 %1060 }
 0x5ca   : >> { %v1089_v7 = vmax.f32 %v1049_v30, %v1061_v42 }
 0x5cd   : >> { %v1064_v44 = vpop.xlane.xlu1 %1063 }
 0x5ce   : >> { %v1090_v29 = vmax.f32 %v1086_v13, %v1064_v44 }
 0x5d1   : >> { %v1067_v48 = vpop.xlane.xlu1 %1066 }
 0x5d2   : >> { %v1091_v26 = vmax.f32 %v1087_v62, %v1067_v48 }
 0x5d5   : >> { %v1070_v50 = vpop.xlane.xlu1 %1069 }
 0x5d6   : >> { %v1092_v2 = vmax.f32 %v1088_v18, %v1070_v50  ;;  %v2261_v50 = vld [vmem:[#allocation13_spill] sm:$0xff] }
 0x5d9   : >> { %v1073_v54 = vpop.xlane.xlu1 %1072 }
 0x5da   : >> { %v1093_v0 = vmax.f32 %v1089_v7, %v1073_v54 }
 0x5dd   : >> { %v1076_v60 = vpop.xlane.xlu1 %1075 }
 0x5de   : >> { %v1094_v21 = vmax.f32 %v1090_v29, %v1076_v60 }
 0x5df   : >> { %v1079_v11 = vpop.xlane.xlu0 %1078 }
 0x5e0   : >> { %v1095_v3 = vmax.f32 %v1091_v26, %v1079_v11 }
 0x5e2   : >> { %v1098_v6 = vmax.f32 %v1094_v21, %v1095_v3 }
 0x5e5   : >> { %v1082_v20 = vpop.xlane.xlu1 %1081 }
 0x5e6   : >> { %v1096_v25 = vmax.f32 %v1092_v2, %v1082_v20 }
 0x5e7   : >> { %v1085_v5 = vpop.xlane.xlu0 %1084 }
 0x5e8   : >> { %v1097_v4 = vmax.f32 %v1093_v0, %v1085_v5 }
 0x5ea   : >> { %v1099_v15 = vmax.f32 %v1096_v25, %v1097_v4 }
 0x5ec   : >> { %v1100_v63 = vmax.f32 %v1098_v6, %v1099_v15 }
 0x5ee   : >> { %v1101_v8 = vrot.slane %v1100_v63, 4 }
 0x5f0   : >> { %v1102_v19 = vmax.f32 %v1100_v63, %v1101_v8 }
 0x5f2   : >> { %v1103_v22 = vrot.slane %v1102_v19, 2 }
 0x5f4   : >> { %v1104_v36 = vmax.f32 %v1102_v19, %v1103_v22 }
 0x5f6   : >> { %v1105_v32 = vrot.slane %v1104_v36, 1 }
 0x5f8   : >> { %v2090_v23 = vmax.f32 %v1104_v36, %v1105_v32 }
 0x5fa   : >> { %v1108_v30 = vsub.f32 %v1994_v24, %v2090_v23  ;;  %v1109_v26 = vsub.f32 %v1996_v27, %v2090_v23  ;;  %v1110_v2 = vsub.f32 %v1998_v28, %v2090_v23  ;;  %v1111_v0 = vsub.f32 %v2002_v31, %v2090_v23 }
 0x5fb   : >> { %v1112_v4 = vsub.f32 %v2006_v33, %v2090_v23  ;;  %v1113_v6 = vsub.f32 %v2008_v34, %v2090_v23  ;;  %v1114_v15 = vsub.f32 %v2010_v35, %v2090_v23  ;;  %v1115_v21 = vsub.f32 %v2014_v37, %v2090_v23 }
 0x5fc   : >> { %v1116_v25 = vsub.f32 %v2018_v39, %v2090_v23  ;;  %v1117_v29 = vsub.f32 %v2020_v40, %v2090_v23  ;;  %v1118_v63 = vsub.f32 %v2022_v41, %v2090_v23  ;;  %v1119_v3 = vsub.f32 %v2026_v43, %v2090_v23 }
 0x5fd   : >> { %v1120_v5 = vsub.f32 %v2030_v45, %v2090_v23  ;;  %v1121_v7 = vsub.f32 %v2032_v46, %v2090_v23  ;;  %v1122_v8 = vsub.f32 %v2034_v47, %v2090_v23  ;;  %v1123_v24 = vsub.f32 %v2038_v49, %v2090_v23 }
 0x5fe   : >> { %v1124_v27 = vsub.f32 %v2042_v51, %v2090_v23  ;;  %v1125_v28 = vsub.f32 %v2044_v52, %v2090_v23  ;;  %v1126_v31 = vsub.f32 %v2046_v53, %v2090_v23  ;;  %v1127_v33 = vsub.f32 %v2050_v55, %v2090_v23  ;;  %v2260_v51 = vld [vmem:[#allocation14_spill] sm:$0xff] }
 0x5ff   : >> { %v1128_v34 = vsub.f32 %v2054_v57, %v2090_v23  ;;  %v1129_v35 = vsub.f32 %v2056_v58, %v2090_v23  ;;  %v1130_v37 = vsub.f32 %v2058_v59, %v2090_v23  ;;  %v1131_v39 = vsub.f32 %v2062_v61, %v2090_v23 }
 0x600   : >> { %v1132_v40 = vsub.f32 %v2066_v1, %v2090_v23  ;;  %v1133_v41 = vsub.f32 %v2068_v9, %v2090_v23  ;;  %v1134_v43 = vsub.f32 %v2070_v10, %v2090_v23  ;;  %v1135_v45 = vsub.f32 %v2074_v12, %v2090_v23 }
 0x601   : >> { %v1136_v46 = vsub.f32 %v2078_v14, %v2090_v23  ;;  %v1137_v47 = vsub.f32 %v2080_v16, %v2090_v23  ;;  %v1138_v49 = vsub.f32 %v2082_v17, %v2090_v23  ;;  %v1139_v52 = vsub.f32 %v2260_v51, %v2090_v23 }
 0x602   : >> { %v1140_v53 = vpack.c.bf16 %v1110_v2, %v1108_v30  ;;  %v1141_v55 = vpack.c.bf16 %v1111_v0, %v1109_v26  ;;  %v1142_v57 = vpack.c.bf16 %v1114_v15, %v1112_v4  ;;  %v1143_v58 = vpack.c.bf16 %v1115_v21, %v1113_v6 }
 0x603   : >> { %v1144_v59 = vpack.c.bf16 %v1118_v63, %v1116_v25  ;;  %v1145_v61 = vpack.c.bf16 %v1119_v3, %v1117_v29  ;;  %v1146_v1 = vpack.c.bf16 %v1122_v8, %v1120_v5  ;;  %v1147_v9 = vpack.c.bf16 %v1123_v24, %v1121_v7 }
 0x604   : >> { %v1148_v10 = vpack.c.bf16 %v1126_v31, %v1124_v27  ;;  %v1149_v12 = vpack.c.bf16 %v1127_v33, %v1125_v28  ;;  %v1150_v14 = vpack.c.bf16 %v1130_v37, %v1128_v34  ;;  %v1151_v19 = vpack.c.bf16 %v1131_v39, %v1129_v35  ;;  %v1256_v35 = vld [vmem:[%s1255_s8] sm:$0x7] }
 0x605   : >> { %v1152_v38 = vpack.c.bf16 %v1134_v43, %v1132_v40  ;;  %v1153_v16 = vpack.c.bf16 %v1135_v45, %v1133_v41  ;;  %v2156_v42 = vpack.c.bf16 %v1138_v49, %v1136_v46  ;;  %v1155_v17 = vpack.c.bf16 %v1139_v52, %v1137_v47  ;;  %v2262_v43 = vld [vmem:[#allocation11_spill] sm:$0xff] }
 0x606   : >> { %v1157_v44 = vmul.bf16 1069105081, %v1140_v53  ;;  %v1160_v48 = vmul.bf16 1069105081, %v1141_v55  ;;  %v2160_v8 = vmax.f32 %v2261_v50, %v2090_v23   ;;  %v1166_v54 = vmul.bf16 1069105081, %v1143_v58 }
 0x607   : >> { %v1163_v56 = vmul.bf16 1069105081, %v1142_v57  ;;  %v1172_v60 = vmul.bf16 1069105081, %v1145_v61  ;;  %v1169_v11 = vmul.bf16 1069105081, %v1144_v59  ;;  %v2263_v45 = vpack.c.bf16 %v2262_v43, %v2262_v43 }
 0x608   : >> { %1762 = vpow.bf16 %v1157_v44  ;;  %v1260_v62 = vsub.f32 %v2261_v50, %v2160_v8  ;;  %v1178_v13 = vmul.bf16 1069105081, %v1147_v9  ;;  %v1175_v18 = vmul.bf16 1069105081, %v1146_v1  ;;  %v1306_v49 = vld [vmem:[#allocation2] sm:$0x77] }
 0x609   : >> { %1764 = vpow.bf16 %v1160_v48  ;;  %v1184_v22 = vmul.bf16 1069105081, %v1149_v12  ;;  %v1181_v30 = vmul.bf16 1069105081, %v1148_v10  ;;  %v1190_v26 = vmul.bf16 1069105081, %v1151_v19 }
 0x60a   : >> { %1766 = vpow.bf16 %v1166_v54  ;;  %v1187_v4 = vmul.bf16 1069105081, %v1150_v14  ;;  %v1257_v6 = vsub.f32 %v2090_v23, %v2160_v8  ;;  %v1196_v15 = vmul.bf16 1069105081, %v1153_v16  ;;  %v2264_v14 = vld [vmem:[#allocation8_spill] sm:$0xff] }
 0x60b   : >> { %1768 = vpow.bf16 %v1163_v56  ;;  %v1193_v25 = vmul.bf16 1069105081, %v1152_v38  ;;  %v1202_v3 = vmul.bf16 1069105081, %v1155_v17  ;;  %v1199_v23 = vmul.bf16 1069105081, %v2156_v42 }
 0x60c   : >> { %1770 = vpow.bf16 %v1172_v60  ;;  %v1258_v63 = vmul.f32 1.442695, %v1257_v6  ;;  %v1261_v46 = vmul.f32 1.442695, %v1260_v62  ;;  %v1248_v19 = vsub.s32 2, %v2264_v14 }
 0x60d   : >> { %1772 = vpow.bf16 %v1169_v11  ;;  %v2265_v44 = vmov (%p864_p4), 0.0   ;;  %v2266_v54 = vmov (%p864_p4), 0   ;;  %v1710_v56 = vld [vmem:[%s2224_s4 + $0x4] sm:$0xf] (%p864_p4)  ;;  %v1427_v8 = vld [vmem:[%s2225_s5] sm:$0xf] (%p864_p4) }
 0x60e   : >> { %1774 = vpow.bf16 %v1178_v13  ;;  %1800 = vset.pattern.permute.xlu0 (%p864_p4), %v2266_v54  ;;  %v1715_v62 = vld [vmem:[%s2225_s5 + $0x4] sm:$0xf] (%p864_p4) }
 0x60f   : >> { %1776 = vpow.bf16 %v1175_v18  ;;  %1430 = vperm.xlu0 (%p864_p4), %1800, %v1427_v8   ;;  %v2267_v11 = vld [vmem:[#allocation8_spill] sm:$0xff] (%p864_p4) }
 0x610   : >> { %1778 = vpow.bf16 %v1184_v22  ;;  %v1324_v13 = vsub.s32 (%p864_p4), 6, %v2267_v11 }
 0x611   : >> { %1780 = vpow.bf16 %v1181_v30 }
 0x612   : >> { %1782 = vpow.bf16 %v1190_v26 }
 0x613   : >> { %v1763_v20 = vpop.eup %1762  ;;  %1784 = vpow.bf16 %v1187_v4  ;;  %1541 = vperm.xlu0 (%p864_p4), %1800, %v1715_v62   ;;  %v1831_v4 = vmov (%p864_p4), 839922192  }
 0x614   : >> { %v1765_v36 = vpop.eup %1764  ;;  %1786 = vpow.bf16 %v1196_v15  ;;  %v1433_v6 = vunpack.c.l.s4 (%p864_p4), %v1831_v4 }
 0x615   : >> { %1204 = vmatprep.subr.bf16.mxu1 %v1765_v36  ;;  %1265 = vmatprep.subr.bf16.mxu0 %v1765_v36  ;;  %v1767_v32 = vpop.eup %1766  ;;  %1788 = vpow.bf16 %v1193_v25 }
 0x616   : >> { %1205 = vmatpush1.bf16.xpose.msra.mxu1 %v1763_v20  ;;  %1266 = vmatpush1.bf16.msra.mxu0 %v1763_v20  ;;  %v1769_v2 = vpop.eup %1768  ;;  %1790 = vpow2.f32 %v1258_v63 }
 0x617   : >> { %1206 = vmatprep.subr.bf16.mxu1 %v1767_v32  ;;  %1267 = vmatprep.subr.bf16.mxu0 %v1767_v32  ;;  %v1771_v0 = vpop.eup %1770  ;;  %1792 = vpow.bf16 %v1202_v3 }
 0x618   : >> { %v1773_v21 = vpop.eup %1772  ;;  %1794 = vpow.bf16 %v1199_v23  ;;  %v2268_v23 = vld [vmem:[#allocation7_spill] sm:$0xff] (%p864_p4) }
 0x619   : >> { %v1775_v29 = vpop.eup %1774  ;;  %1796 = vpow2.f32 %v1261_v46 }
 0x61a   : >> { %1268 = vmatpush1.bf16.msra.mxu0 %v1769_v2  ;;  %v1777_v5 = vpop.eup %1776 }
 0x61b   : >> { %1269 = vmatprep.subr.bf16.mxu0 %v1771_v0  ;;  %v1779_v7 = vpop.eup %1778 }
 0x61c   : >> { %v1781_v24 = vpop.eup %1780 }
 0x61d   : >> { %v1783_v27 = vpop.eup %1782 }
 0x61e   : >> { %1207 = vmatpush1.bf16.xpose.msra.mxu1 %v1769_v2  ;;  %1270 = vmatpush1.bf16.msra.mxu0 %v1773_v21  ;;  %v1785_v28 = vpop.eup %1784 }
 0x61f   : >> { %1208 = vmatprep.subr.bf16.mxu1 %v1771_v0  ;;  %1271 = vmatprep.subr.bf16.mxu0 %v1775_v29  ;;  %v1787_v31 = vpop.eup %1786  ;;  %v1341_v0 = vld [vmem:[%s2224_s4] sm:$0xf] (%p864_p4) }
 0x620   : >> { %v1789_v33 = vpop.eup %1788 }
 0x621   : >> { %v1791_v34 = vpop.eup %1790 }
 0x622   : >> { %1272 = vmatpush1.bf16.msra.mxu0 %v1777_v5  ;;  %v1793_v37 = vpop.eup %1792  ;;  %v1263_v39 = vmul.f32 %v1791_v34, %v1256_v35  ;;  %v2269_v35 = vld [vmem:[#allocation6_spill] sm:$0xff] (%p864_p4) }
 0x623   : >> { %1273 = vmatprep.subr.bf16.mxu0 %v1779_v7  ;;  %v1795_v40 = vpop.eup %1794 }
 0x624   : >> { %v1264_v41 = vpack.c.bf16 %v1263_v39, %v1263_v39  ;;  %v1797_v47 = vpop.eup %1796 }
 0x625   : >> { %v1307_v53 = vmul.f32 %v1797_v47, %v1306_v49 }
 0x626   : >> { %1209 = vmatpush1.bf16.xpose.msra.mxu1 %v1773_v21  ;;  %1274 = vmatpush1.bf16.msra.mxu0 %v1781_v24  ;;  %v1434_v21 = vunpack.c.0.s8 (%p864_p4), %v1433_v6 }
 0x627   : >> { %1210 = vmatprep.subr.bf16.mxu1 %v1775_v29  ;;  %1275 = vmatprep.subr.bf16.mxu0 %v1783_v27 }
 0x628   : > { %v1437_v25 = vsub.s32 (%p864_p4), %v1434_v21, %v2267_v11 }
 0x62a   : >> { %1276 = vmatpush1.bf16.msra.mxu0 %v1785_v28 }
 0x62b   : >> { %1277 = vmatprep.subr.bf16.mxu0 %v1787_v31 }
 0x62e   : >> { %1211 = vmatpush1.bf16.xpose.msra.mxu1 %v1777_v5  ;;  %1278 = vmatpush1.bf16.msra.mxu0 %v1789_v33 }
 0x62f   : >> { %1212 = vmatprep.subr.bf16.mxu1 %v1779_v7  ;;  %1279 = vmatprep.subr.bf16.mxu0 %v1793_v37 }
 0x632   : >> { %1280 = vmatpush1.bf16.msra.mxu0 %v1795_v40 }
 0x635   : >> { %1298 = vmatmul.mubr.bf16.vlgmr.msra.gmra.mrb[32].mxu0 %v1264_v41 }
 0x636   : >> { %1213 = vmatpush1.bf16.xpose.msra.mxu1 %v1781_v24  ;;  %1415 = vmatprep.mubr.f32.mxu0 (%p864_p4), %v2265_v44 }
 0x637   : >> { %1214 = vmatprep.subr.bf16.mxu1 %v1783_v27 }
 0x63e   : >> { %1215 = vmatpush1.bf16.xpose.msra.mxu1 %v1785_v28 }
 0x63f   : >> { %1216 = vmatprep.subr.bf16.mxu1 %v1787_v31 }
 0x646   : >> { %1217 = vmatpush1.bf16.xpose.msra.mxu1 %v1789_v33 }
 0x647   : >> { %1218 = vmatprep.subr.bf16.mxu1 %v1793_v37 }
 0x64e   : >> { %1219 = vmatpush1.bf16.xpose.msra.mxu1 %v1795_v40 }
 0x655   : >> { %1237 = vmatmul.mubr.bf16.vlgmr.msra.gmra.mrb[0].mxu1 %v2263_v45 }
 0x656   : > { %1525 = vmatprep.mubr.f32.mxu1 (%p864_p4), %v2265_v44 }
 0x68e   : > { %v1431_v15 = vpop.permute.xlu0 (%p864_p4), %1430 }
 0x68f   : > { %v1438_v34 = vrot.slane (%p864_p4), %v1431_v15, %v1437_v25 }
 0x692   : > { %v1542_v29 = vpop.permute.xlu0 (%p864_p4), %1541 }
 0x693   : > { %v1549_v7 = vrot.slane (%p864_p4), %v1542_v29, %v1437_v25 }
 0x708   : >> { %v1299_v51 = vpop.f32.mrb[32].mxu0 }
 0x709   : >> { %v1301_v52 = vpop.f32.mrb[33].mxu0 }
 0x70a   : >> { %v1310_v55 = vcombine.low %v1299_v51, %v1301_v52  ;;  %v1303_v57 = vpop.f32.mrb[34].mxu0 }
 0x70b   : >> { %v1304_v58 = vpop.f32.mrb[35].mxu0 }
 0x70c   : >> { %v1312_v59 = vadd.f32 %v1310_v55, %v1307_v53 }
 0x70e   : >> { %1313 = vst [vmem:[#allocation2] sm:$0x77] %v1312_v59 }
 0x715   : > { %v1314_v50 = vld [vmem:[#allocation2] sm:$0x77] (%p864_p4) }
 0x716   : > { %v1315_v60 = vmax.f32 (%p864_p4), %v1314_v50, 1e-30 }
 0x728   : >> { %v1238_v61 = vpop.f32.mrb[0].mxu1 }
 0x729   : >> { %v1244_v1 = vmax.f32 %v1238_v61, 1e-30  ;;  %v1240_v9 = vpop.f32.mrb[1].mxu1 }
 0x72a   : >> { %v1241_v10 = vpop.f32.mrb[2].mxu1 }
 0x72b   : >> { %1798 = vrcp.f32 %v1244_v1  ;;  %v1242_v12 = vpop.f32.mrb[3].mxu1 }
 0x72c   : > { %1801 = vrcp.f32 (%p864_p4), %v1315_v60 }
 0x734   : > { %866 = sbr.rel (!%p864_p4) target bundleno = 990 (0x3de), region = 103 }
 0x735   : >> { %v1799_v38 = vpop.eup %1798 }
 0x736   : >> { %v1249_v16 = vrot.slane %v1799_v38, %v1248_v19  ;;  %v1802_v18 = vpop.eup (%p864_p4), %1801 }
 0x737   : > { %v1321_v20 = vrot.slane (%p864_p4), %v1802_v18, %v1248_v19  ;;  %v1325_v22 = vrot.slane (%p864_p4), %v1802_v18, %v1324_v13 }
 0x738   : >> { %v1250_v42 = vmul.f32 %v1249_v16, %v1238_v61 }
 0x739   : > { %v1331_v36 = vrot.slane (%p864_p4), %v1321_v20, %v1248_v19  ;;  %v1335_v32 = vrot.slane (%p864_p4), %v1325_v22, %v1248_v19 }
 0x73a   : >> { %1253 = vst [vmem:[%s1252_s10] sm:$0x3] %v1250_v42 }
 0x73b   : > { %v1338_v30 = vcombine.low %v1331_v36, %v1335_v32 }
 0x73d   : > { %v1340_v26 = vmul.f32 %v1338_v30, %v1314_v50 }
 0x73f   : > { %v1343_v2 = vcombine.high %v1340_v26, %v1340_v26 }
 0x741   : > { %v1711_v17 = vld.sshfl [vmem:[#allocation3] sm:$0x33 pattern:$0x76325410]  ;;  %1707 = vmatprep.subr.msk.mxu0 %vm672_vm2, %v1343_v2 }
 0x742   : > { %v1453_v48 = vcombine.high %v1711_v17, %v1711_v17  ;;  %1708 = vmatpush1.msk.msra.mxu0 %vm672_vm2, %v1340_v26 }
 0x743   : > { %1709 = vmatmul.mubr.msk.f32.vlgmr.msra.gmra.mrb[0].mxu0 %vm668_vm4, %v1341_v0 }
 0x744   : > { %1712 = vmatprep.subr.msk.mxu1 %vm672_vm2, %v1453_v48 }
 0x745   : > { %1713 = vmatpush1.msk.msra.mxu1 %vm672_vm2, %v1711_v17 }
 0x746   : > { %1714 = vmatmul.mubr.msk.f32.vlgmr.msra.gmra.mrb[0].mxu1 %vm668_vm4, %v1710_v56 }
 0x816   : > { %v1417_v28 = vpop.f32.mrb[0].mxu0 }
 0x817   : > { %v1419_v31 = vpop.f32.mrb[1].mxu0 }
 0x818   : > { %v1424_v33 = vcombine.low %v1417_v28, %v1419_v31 }
 0x819   : > { %v1527_v63 = vpop.f32.mrb[0].mxu1 }
 0x81a   : > { %v1529_v3 = vpop.f32.mrb[1].mxu1  ;;  %v1426_v37 = vadd.f32 %v1424_v33, %v2269_v35 }
 0x81b   : > { %v1534_v5 = vcombine.low %v1527_v63, %v1529_v3 }
 0x81c   : > { %v1440_v39 = vadd.f32 %v1438_v34, %v1426_v37 }
 0x81d   : > { %v1536_v24 = vadd.f32 %v1534_v5, %v2268_v23 }
 0x81e   : > { %1441 = vst [vmem:[%s306_s13] sm:$0xff] %v1440_v39 }
 0x81f   : > { %v1551_v27 = vadd.f32 %v1549_v7, %v1536_v24 }
 0x821   : > { %1552 = vst [vmem:[%s311_s16] sm:$0xff] %v1551_v27 }
 0x822 PF: > { %s18_s24 = sadd.s32 1, %s1817_s24  }
 0x823   : > { %p15_p5 = scmp.ge.s32.totalorder %s18_s24, 4  }
 0x825   :  { %17 = sbr.rel (!%p15_p5) target bundleno = 1 (0x1), region = 114 }

</bundles_post_ra>
